<compile_context>
chip_gen: v7x
topology: tpu7x:2x2x1
jax: 0.10.0
libtpu: 0.0.40
codegen_flags: <defaults>
</compile_context>

<pallas_src>
import jax
import jax.numpy as jnp
from jax.experimental import pallas as pl
from jax.experimental.pallas import tpu as pltpu


def _gain_kernel(x_ref, g_ref, o_ref):
    # (TM, TILE_HW) * (TM, 1) broadcast multiply.  abs/pow already hoisted to
    # the wrapper -> pure vld/vmul/vst, HBM-bandwidth bound.  Sub-32-bit inputs
    # are upcast to f32 for the multiply (free: huge VPU slack) so numerics
    # match the reference exactly.
    x = x_ref[...]
    if x.dtype.itemsize < 4:
        x = x.astype(jnp.float32)
    o_ref[...] = (x * g_ref[...]).astype(o_ref.dtype)


def _round_up(v, m):
    return -(-v // m) * m


def _pick_tiles(rows_p, hw_p, itemsize, sm, budget_bytes=4 * 1024 * 1024):
    """Pick (tm, tile_hw) that exactly divide (rows_p, hw_p).

    Prefer full-row (contiguous-DMA) tiles; split HW only when a single
    sublane-multiple row slab already exceeds the per-block budget.
    """
    if sm * hw_p * itemsize <= budget_bytes:
        tile_hw = hw_p
        tm = max(sm, (budget_bytes // (hw_p * itemsize)) // sm * sm)
        tm = min(tm, rows_p)
        while rows_p % tm:          # snap to an exact divisor (keeps stores unmasked)
            tm -= sm
    else:
        tm = sm
        tile_hw = max(128, (budget_bytes // (sm * itemsize)) // 128 * 128)
        tile_hw = min(tile_hw, hw_p)
        while hw_p % tile_hw:
            tile_hw -= 128
    return tm, tile_hw


def _dimension_semantics(n_row_tiles):
    """Row axis CORE_PARALLEL on v7x (2 TensorCores/chip); plain parallel otherwise."""
    kind = ""
    try:
        kind = jax.devices()[0].device_kind.lower()
    except Exception:
        pass
    if "v7" in kind and n_row_tiles > 1:
        return (pltpu.CORE_PARALLEL, pltpu.PARALLEL)
    return ("parallel", "parallel")


def gain_module_forward(x, gain_matrix, n, l=1.0):
    """Pallas implementation of Gain_Module.forward (bias=False).

    x:           (B, C, H, W)
    gain_matrix: (n_scales, C)   (the nn.Parameter)
    n:           int index array of length B (quantization level per batch elem)
    l:           STATIC Python float interpolation coefficient
    """
    B, C, H, W = x.shape
    HW = H * W
    rows = B * C
    n = jnp.asarray(n, dtype=jnp.int32)
    l = float(l)

    # --- precompute the (B, C) gain in f32 in the wrapper (O(B*C) work) ---------
    gm = gain_matrix.astype(jnp.float32)
    if l != 1.0:
        # PyTorch would raise when n[0] + 1 == n_scales; check when n is concrete.
        n0p1 = None
        try:
            n0p1 = int(n[0]) + 1
        except Exception:
            pass  # traced n: jnp.take clamps (documented divergence from PyTorch)
        if n0p1 is not None and n0p1 >= gm.shape[0]:
            raise IndexError(
                f"Gain_Module: n[0] + 1 = {n0p1} is out of range for gain_matrix "
                f"with {gm.shape[0]} scales")
        g1 = jnp.abs(jnp.take(gm, n, axis=0))                # (B, C)
        g2 = jnp.abs(jnp.take(gm, n[0] + 1, axis=0))[None]   # (1, C), broadcasts over B
        gain = g1 ** l * g2 ** (1.0 - l)                     # (B, C)
    else:
        gain = jnp.abs(jnp.take(gm, n, axis=0))              # (B, C)

    # TODO(synk): bias=True branch (adds self.bias[n] broadcast over H, W) is not
    # implemented; the module's default is bias=False.

    # --- flatten to a lane-dense (rows, HW) slab, pad to (sublane,128) multiples -
    itemsize = jnp.dtype(x.dtype).itemsize
    sm = max(8, 32 // itemsize)        # sublane multiple: 8 f32, 16 bf16, 32 int8/fp8
    rows_p = _round_up(rows, sm)
    hw_p = _round_up(HW, 128)

    x2d = x.reshape(rows, HW)
    g2d = gain.reshape(rows, 1).astype(jnp.float32)
    if rows_p != rows or hw_p != HW:
        x2d = jnp.pad(x2d, ((0, rows_p - rows), (0, hw_p - HW)))
    if rows_p != rows:
        g2d = jnp.pad(g2d, ((0, rows_p - rows), (0, 0)))

    tm, tile_hw = _pick_tiles(rows_p, hw_p, itemsize, sm)
    grid = (rows_p // tm, hw_p // tile_hw)

    cost = pl.CostEstimate(
        flops=rows_p * hw_p,
        transcendentals=0,
        bytes_accessed=2 * rows_p * hw_p * itemsize + rows_p * 4,
    )

    out2d = pl.pallas_call(
        _gain_kernel,
        out_shape=jax.ShapeDtypeStruct((rows_p, hw_p), x.dtype),
        grid_spec=pl.GridSpec(
            grid=grid,
            in_specs=[
                pl.BlockSpec((tm, tile_hw), lambda i, j: (i, j)),  # x tile
                pl.BlockSpec((tm, 1), lambda i, j: (i, 0)),        # per-row gain column
            ],
            out_specs=pl.BlockSpec((tm, tile_hw), lambda i, j: (i, j)),
        ),
        compiler_params=pltpu.CompilerParams(
            dimension_semantics=_dimension_semantics(grid[0]),
            vmem_limit_bytes=48 * 1024 * 1024,
        ),
        cost_estimate=cost,
    )(x2d, g2d)

    if rows_p != rows or hw_p != HW:
        out2d = out2d[:rows, :HW]
    return out2d.reshape(B, C, H, W)


def _reference_forward(x, gain_matrix, n, l=1.0):
    """Pure-JAX transcription of the PyTorch forward for verification."""
    n = jnp.asarray(n, dtype=jnp.int32)
    gm = gain_matrix.astype(jnp.float32)
    if l != 1:
        gain1 = jnp.take(gm, n, axis=0)
        gain2 = jnp.take(gm, n[0] + 1, axis=0)[None, :]
        gain = jnp.abs(gain1) ** l * jnp.abs(gain2) ** (1 - l)
    else:
        gain = jnp.abs(jnp.take(gm, n, axis=0))
    reshaped_gain = gain[:, :, None, None]
    return (reshaped_gain * x.astype(jnp.float32)).astype(x.dtype)


if __name__ == "__main__":
    key = jax.random.PRNGKey(0)
    k_gain, k_x, k_x2, k_x3, k_x4 = jax.random.split(key, 5)

    # ---- small test (consistent with Gain_Module(n=6, N=C)) ---------------------
    n_scales = 6
    B, C, H, W = 2, 4, 16, 16
    gain_matrix = 1.0 + 0.1 * jax.random.normal(k_gain, (n_scales, C), dtype=jnp.float32)
    x = jax.random.normal(k_x, (B, C, H, W), dtype=jnp.float32)
    n_idx = jnp.array([1, 3], dtype=jnp.int32)

    # interpolated case (l != 1)
    l = 0.7
    out = jax.block_until_ready(gain_module_forward(x, gain_matrix, n_idx, l=l))
    ref = _reference_forward(x, gain_matrix, n_idx, l=l)
    assert out.shape == (B, C, H, W)
    assert jnp.allclose(out, ref, atol=1e-5, rtol=1e-5)

    # plain case (l == 1)
    out1 = jax.block_until_ready(gain_module_forward(x, gain_matrix, n_idx, l=1))
    ref1 = _reference_forward(x, gain_matrix, n_idx, l=1)
    assert jnp.allclose(out1, ref1, atol=1e-5, rtol=1e-5)

    # ---- unaligned shapes: exercises the wrapper-side padding path --------------
    Bu, Cu, Hu, Wu = 1, 3, 5, 7
    gm_u = 1.0 + 0.1 * jax.random.normal(k_gain, (n_scales, Cu), dtype=jnp.float32)
    xu = jax.random.normal(k_x3, (Bu, Cu, Hu, Wu), dtype=jnp.float32)
    nu = jnp.array([2], dtype=jnp.int32)
    outu = jax.block_until_ready(gain_module_forward(xu, gm_u, nu, l=0.5))
    refu = _reference_forward(xu, gm_u, nu, l=0.5)
    assert jnp.allclose(outu, refu, atol=1e-5, rtol=1e-5)

    # ---- medium test: full-row contiguous-DMA branch, large row tile ------------
    B2, C2, H2, W2 = 2, 128, 64, 64
    gain_matrix2 = 1.0 + 0.1 * jax.random.normal(k_gain, (n_scales, C2), dtype=jnp.float32)
    x2 = jax.random.normal(k_x2, (B2, C2, H2, W2), dtype=jnp.float32)
    n_idx2 = jnp.array([0, 4], dtype=jnp.int32)
    out2 = jax.block_until_ready(gain_module_forward(x2, gain_matrix2, n_idx2, l=0.3))
    ref2 = _reference_forward(x2, gain_matrix2, n_idx2, l=0.3)
    assert jnp.allclose(out2, ref2, atol=1e-5, rtol=1e-5)

    # ---- large-HW test: exercises the HW-split branch (row slab > budget) -------
    B3, C3, H3, W3 = 1, 8, 512, 512
    gm3 = 1.0 + 0.1 * jax.random.normal(k_gain, (n_scales, C3), dtype=jnp.float32)
    x3 = jax.random.normal(k_x4, (B3, C3, H3, W3), dtype=jnp.float32)
    n3 = jnp.array([3], dtype=jnp.int32)
    out3 = jax.block_until_ready(gain_module_forward(x3, gm3, n3, l=0.6))
    ref3 = _reference_forward(x3, gm3, n3, l=0.6)
    assert jnp.allclose(out3, ref3, atol=1e-5, rtol=1e-5)

    # ---- bf16 I/O path (f32 math inside the kernel, 16-row sublane padding) -----
    xb = x.astype(jnp.bfloat16)
    outb = jax.block_until_ready(gain_module_forward(xb, gain_matrix, n_idx, l=l))
    refb = _reference_forward(xb, gain_matrix, n_idx, l=l)
    assert outb.dtype == jnp.bfloat16
    assert jnp.allclose(outb.astype(jnp.float32), refb.astype(jnp.float32),
                        atol=1e-2, rtol=1e-2)

    print("KERNEL_OK")
</pallas_src>

<mosaic_0001>
module attributes {stable_mosaic.version = 11 : i64} {
  func.func @_gain_kernel(%arg0: i32, %arg1: i32, %arg2: memref<8x256xf32, #tpu.memory_space<vmem>>, %arg3: memref<8x1xf32, #tpu.memory_space<vmem>>, %arg4: memref<8x256xf32, #tpu.memory_space<vmem>>) attributes {dimension_semantics = [#tpu.dimension_semantics<parallel>, #tpu.dimension_semantics<parallel>], iteration_bounds = array<i64: 1, 1>, scalar_prefetch = 0 : i64, scratch_operands = 0 : i64, tpu.core_type = #tpu.core_type<tc>, window_params = [{transform_indices = @transform_0, window_bounds = array<i64: 8, 256>}, {transform_indices = @transform_1, window_bounds = array<i64: 8, 1>}, {transform_indices = @transform_2, window_bounds = array<i64: 8, 256>}]} {
    %c0 = arith.constant 0 : index
    %c0_0 = arith.constant 0 : index
    %0 = vector.load %arg2[%c0, %c0_0] : memref<8x256xf32, #tpu.memory_space<vmem>>, vector<8x256xf32>
    %c0_1 = arith.constant 0 : index
    %c0_2 = arith.constant 0 : index
    %1 = vector.load %arg3[%c0_1, %c0_2] : memref<8x1xf32, #tpu.memory_space<vmem>>, vector<8x1xf32>
    %2 = vector.broadcast %1 : vector<8x1xf32> to vector<8x256xf32>
    %3 = arith.mulf %0, %2 : vector<8x256xf32>
    %c0_3 = arith.constant 0 : index
    %c0_4 = arith.constant 0 : index
    %4 = vector.load %arg4[%c0_3, %c0_4] : memref<8x256xf32, #tpu.memory_space<vmem>>, vector<8x256xf32>
    tpu.vector_store %arg4[%c0_3, %c0_4], %3 {strides = array<i32>} : memref<8x256xf32, #tpu.memory_space<vmem>>, vector<8x256xf32>,
    return
  }
  func.func @transform_0(%arg0: i32, %arg1: i32) -> (i32, i32) {
    %c0_i32 = arith.constant 0 : i32
    return %arg0, %arg1 : i32, i32
  }
  func.func @transform_1(%arg0: i32, %arg1: i32) -> (i32, i32) {
    %c0_i32 = arith.constant 0 : i32
    %c0_i32_0 = arith.constant 0 : i32
    return %arg0, %c0_i32 : i32, i32
  }
  func.func @transform_2(%arg0: i32, %arg1: i32) -> (i32, i32) {
    %c0_i32 = arith.constant 0 : i32
    return %arg0, %arg1 : i32, i32
  }
}

</mosaic_0001>

<bundles_post_ra>
// kernel: tpu_custom_call.1
= control target key start
LH: loop header
LB: loop body
LE: loop exit
PB: predicated region body
PF: predicated region fallthrough
CT: control target
= control target key end

     0   :  { %7 = vsyncpa [#allocation3], 0  ;;  %s148_s0 = inlined_call_operand.hbm [shape: f32[8,256], index: 0, kind: input, shape index: {}]   ;;  %s149_s1 = inlined_call_operand.vmem [shape: f32[8,1], index: 1, kind: input, shape index: {}]   ;;  %s150_s2 = inlined_call_operand.hbm [shape: f32[8,256], index: 2, kind: output, shape index: {}]  }
   0x1   :  { %8 = vsyncpa [#allocation4], 0  ;;  %s103_s9 = smov [#allocation2]   ;;  %s55_s13 = scalar_lea.hbm %s148_s0, 256 }
   0x2   :  { %s15_s10 = sshll.u32 %s103_s9, 4  ;;  %p56_p0 = scmp.ne.s32.totalorder %s148_s0, %s55_s13  ;;  %s16_s10 = int_to_ptr.vmem [resolvable:$true] %s15_s10 }
   0x3   :  { %p59_p1 = scmp.lt.u32.totalorder %s55_s13, %s148_s0 }
   0x5   :  { %p61_p2 = pnand %p59_p1, %p56_p0 }
   0x7   :  { %64 = shalt.err (!%p61_p2)
}
   0x8   :  { %s65_s18 = scalar_lea.vmem %s16_s10, 256  ;;  %p70_p4 = scmp.lt.s32.totalorder %s16_s10, %s16_s10 }
   0x9   :  { %p66_p3 = scmp.ne.s32.totalorder %s16_s10, %s65_s18  ;;  %p71_p5 = scmp.lt.s32.totalorder %s65_s18, %s65_s18 }
   0xb   :  { %p72_p6 = por %p71_p5, %p70_p4 }
   0xd   :  { %p73_p7 = pnand %p72_p6, %p66_p3 }
   0xf   :  { %76 = shalt.err (!%p73_p7)
}
  0x10   :  { %18 = dma.hbm_to_vmem [thread:$0]  %s148_s0, 256, %s16_s10, [#allocation3]  }
  0x11   :  { %99 = dma.done.wait [#allocation3], 256  }
  0x12   :  { %100 = vsyncadd [#allocation3], 4294967040  ;;  %v104_v0 = vmov 0   ;;  %v26_v1 = vld [vmem:[%s149_s1] sm:$0xff]  ;;  %v25_v3 = vld [vmem:[#allocation2 + $0x8] sm:$0xff]  ;;  %s105_s23 = smov [#allocation5]  }
  0x13   :  { %54 = vset.pattern.permute.xlu0 %v104_v0  ;;  %v24_v2 = vld [vmem:[#allocation2] sm:$0xff]  ;;  %s42_s24 = sshll.u32 %s105_s23, 4  ;;  %s43_s24 = int_to_ptr.vmem [resolvable:$true] %s42_s24 }
  0x14   :  { %29 = vperm.xlu0 %54, %v26_v1   ;;  %s77_s0 = scalar_lea.vmem %s43_s24, 256  ;;  %p82_p9 = scmp.lt.s32.totalorder %s43_s24, %s43_s24 }
  0x15   :  { %p78_p8 = scmp.ne.s32.totalorder %s43_s24, %s77_s0  ;;  %p83_p10 = scmp.lt.s32.totalorder %s77_s0, %s77_s0 }
  0x17   :  { %p84_p11 = por %p83_p10, %p82_p9 }
  0x19   :  { %p85_p12 = pnand %p84_p11, %p78_p8 }
  0x93   :  { %v30_v4 = vpop.permute.xlu0 %29 }
  0x94   :  { %v32_v5 = vmul.f32 %v30_v4, %v24_v2  ;;  %v33_v6 = vmul.f32 %v30_v4, %v25_v3 }
  0x96   :  { %34 = vst [vmem:[#allocation5] sm:$0xff] %v32_v5  ;;  %35 = vst [vmem:[#allocation5 + $0x8] sm:$0xff] %v33_v6 }
  0x97   :  { %88 = shalt.err (!%p85_p12)
}
  0x98   :  { %s89_s26 = scalar_lea.hbm %s150_s2, 256 }
  0x99   :  { %p90_p13 = scmp.ne.s32.totalorder %s150_s2, %s89_s26  ;;  %p93_p0 = scmp.lt.u32.totalorder %s89_s26, %s150_s2 }
  0x9b   :  { %p95_p1 = pnand %p93_p0, %p90_p13 }
  0x9d   :  { %98 = shalt.err (!%p95_p1)
}
  0x9e   :  { %45 = dma.vmem_to_hbm [thread:$0]  %s43_s24, 256, %s150_s2, [#allocation4]  }
  0x9f   :  { %101 = dma.done.wait [#allocation4], 256  }
  0xa0   :  { %102 = vsyncadd [#allocation4], 4294967040 }
  0xa1   :  { %49 = vsyncpa [#allocation3], 1 }
  0xa2   :  { %50 = vsyncpa [#allocation4], 1 }

</bundles_post_ra>
